<compile_context>
chip_gen: v6e
topology: v6e:2x2x1
jax: 0.10.0
libtpu: 0.0.40
codegen_flags: <defaults>
</compile_context>

<pallas_src>
import math

import jax
import jax.numpy as jnp
from jax.experimental import pallas as pl
from jax.experimental.pallas import tpu as pltpu


def _critic_kernel(sa_ref, w1_ref, b1_ref, w2_hbm_ref, b2_ref, w3_ref, b3_ref,
                   q_ref, w2_vmem, dma_sem):
    H = w3_ref.shape[1]

    # Kick off the layer-2 weight DMA (dominant 256 KB of HBM traffic) so it
    # overlaps with the layer-1 matmul below.
    w2_cp = pltpu.make_async_copy(w2_hbm_ref, w2_vmem, dma_sem)
    w2_cp.start()

    # Layer 1, fused across both Q-heads: (B, D) @ (D, 2H) + (1, 2H), ReLU.
    sa_bf = sa_ref[...].astype(jnp.bfloat16)
    h1 = jnp.dot(sa_bf, w1_ref[...], preferred_element_type=jnp.float32) + b1_ref[...]
    h1 = jnp.maximum(h1, 0.0)
    h1a = h1[:, :H].astype(jnp.bfloat16)   # H = 256 is lane-aligned -> free slice
    h1b = h1[:, H:].astype(jnp.bfloat16)

    # Block until the layer-2 weights have landed in VMEM.
    w2_cp.wait()

    # Layer 2: one matmul per head against the stacked (2, H, H) weights.
    # (A 2Hx2H block-diagonal would double the weight bytes of a memory-bound
    # kernel, so the heads stay split.)
    h2a = jnp.maximum(
        jnp.dot(h1a, w2_vmem[0], preferred_element_type=jnp.float32) + b2_ref[:, :H],
        0.0)
    h2b = jnp.maximum(
        jnp.dot(h1b, w2_vmem[1], preferred_element_type=jnp.float32) + b2_ref[:, H:],
        0.0)

    # Layer 3: per-head weights lane-padded to (H, 2) (q1 -> column 0,
    # q2 -> column 1); summing the two partials gives one lane-dense (B, 2)
    # store instead of two masked (B, 1) stores.
    q = (jnp.dot(h2a.astype(jnp.bfloat16), w3_ref[0],
                 preferred_element_type=jnp.float32)
         + jnp.dot(h2b.astype(jnp.bfloat16), w3_ref[1],
                   preferred_element_type=jnp.float32)
         + b3_ref[...])
    q_ref[...] = q


def pack_critic_params(params):
    """One-time preprocessing: fuse/stack per-head weights, cast to bf16."""
    p1, p2 = params["q1"], params["q2"]
    H = p1["w2"].shape[0]
    del H  # shapes are carried by the arrays themselves

    # Layer 1: concatenate head outputs -> (D, 2H).
    w1 = jnp.concatenate([p1["w1"], p2["w1"]], axis=1).astype(jnp.bfloat16)
    b1 = jnp.concatenate([p1["b1"], p2["b1"]], axis=1)            # (1, 2H) f32

    # Layer 2: stack heads -> (2, H, H); biases packed to match h1 layout.
    w2 = jnp.stack([p1["w2"], p2["w2"]], axis=0).astype(jnp.bfloat16)
    b2 = jnp.concatenate([p1["b2"], p2["b2"]], axis=1)            # (1, 2H) f32

    # Layer 3: lane-pad each (H, 1) weight to (H, 2) and stack -> (2, H, 2).
    w3a = jnp.pad(p1["w3"], ((0, 0), (0, 1)))                     # q1 -> col 0
    w3b = jnp.pad(p2["w3"], ((0, 0), (1, 0)))                     # q2 -> col 1
    w3 = jnp.stack([w3a, w3b], axis=0).astype(jnp.bfloat16)
    b3 = jnp.concatenate([p1["b3"], p2["b3"]], axis=1)            # (1, 2) f32

    return dict(w1=w1, b1=b1, w2=w2, b2=b2, w3=w3, b3=b3)


def critic_forward(state, action, packed):
    """Returns (q1, q2), each of shape (B, 1), from pre-packed bf16 params."""
    B = state.shape[0]
    D = state.shape[1] + action.shape[1]
    H = packed["w2"].shape[1]

    # Single tiny concat in the wrapper (fused by XLA); the kernel then does
    # ONE layer-1 weight push instead of two.
    sa = jnp.concatenate([state, action], axis=-1)

    args = (sa, packed["w1"], packed["b1"], packed["w2"], packed["b2"],
            packed["w3"], packed["b3"])

    vmem = pl.BlockSpec(memory_space=pltpu.MemorySpace.VMEM)
    hbm = pl.BlockSpec(memory_space=pl.ANY)   # w2 is DMA'd manually in-kernel
    in_specs = [vmem, vmem, vmem, hbm, vmem, vmem, vmem]

    flops = 2 * B * (D * 2 * H          # layer 1 (fused heads)
                     + 2 * H * H        # layer 2 (both heads)
                     + 2 * H * 2)       # layer 3 (lane-padded)
    bytes_accessed = sum(int(a.size) * a.dtype.itemsize for a in args) + B * 2 * 4

    q = pl.pallas_call(
        _critic_kernel,
        out_shape=jax.ShapeDtypeStruct((B, 2), jnp.float32),
        in_specs=in_specs,
        out_specs=vmem,
        scratch_shapes=[pltpu.VMEM((2, H, H), jnp.bfloat16),
                        pltpu.SemaphoreType.DMA(())],
        cost_estimate=pl.CostEstimate(
            flops=flops, transcendentals=0, bytes_accessed=bytes_accessed),
    )(*args)
    return q[:, 0:1], q[:, 1:2]


def init_linear(key, fan_in, fan_out):
    """Deterministic init mimicking torch.nn.Linear default (uniform +/- 1/sqrt(fan_in))."""
    kw, kb = jax.random.split(key)
    bound = 1.0 / math.sqrt(fan_in)
    w = jax.random.uniform(kw, (fan_in, fan_out), jnp.float32, -bound, bound)
    b = jax.random.uniform(kb, (1, fan_out), jnp.float32, -bound, bound)
    return w, b


def init_critic_params(key, state_dim, action_dim, hidden=256):
    d = state_dim + action_dim
    keys = jax.random.split(key, 6)
    params = {}
    for i, head in enumerate(("q1", "q2")):
        w1, b1 = init_linear(keys[3 * i + 0], d, hidden)
        w2, b2 = init_linear(keys[3 * i + 1], hidden, hidden)
        w3, b3 = init_linear(keys[3 * i + 2], hidden, 1)
        params[head] = {"w1": w1, "b1": b1, "w2": w2, "b2": b2, "w3": w3, "b3": b3}
    return params


if __name__ == "__main__":
    key = jax.random.PRNGKey(0)
    k_state, k_action, k_params = jax.random.split(key, 3)

    batch = 8
    state_dim = 24
    action_dim = 8

    state = jax.random.normal(k_state, (batch, state_dim), jnp.float32)
    action = jax.random.normal(k_action, (batch, action_dim), jnp.float32)
    params = init_critic_params(k_params, state_dim, action_dim)
    packed = pack_critic_params(params)

    q1, q2 = jax.jit(critic_forward)(state, action, packed)
    jax.block_until_ready((q1, q2))

    # Pure-JAX reference mimicking the kernel's bf16-weight / f32-accumulate math.
    sa = jnp.concatenate([state, action], axis=-1)

    def ref_mlp(p):
        h1 = jnp.maximum(
            jnp.dot(sa.astype(jnp.bfloat16), p["w1"].astype(jnp.bfloat16),
                    preferred_element_type=jnp.float32) + p["b1"], 0.0)
        h2 = jnp.maximum(
            jnp.dot(h1.astype(jnp.bfloat16), p["w2"].astype(jnp.bfloat16),
                    preferred_element_type=jnp.float32) + p["b2"], 0.0)
        return jnp.dot(h2.astype(jnp.bfloat16), p["w3"].astype(jnp.bfloat16),
                       preferred_element_type=jnp.float32) + p["b3"]

    r1, r2 = ref_mlp(params["q1"]), ref_mlp(params["q2"])
    assert q1.shape == (batch, 1) and q2.shape == (batch, 1)
    assert jnp.allclose(q1, r1, atol=1e-2, rtol=1e-2), jnp.max(jnp.abs(q1 - r1))
    assert jnp.allclose(q2, r2, atol=1e-2, rtol=1e-2), jnp.max(jnp.abs(q2 - r2))

    print("KERNEL_OK")
</pallas_src>

<mosaic_0001>
module attributes {stable_mosaic.version = 11 : i64} {
  func.func @_critic_kernel(%arg0: memref<8x32xf32, #tpu.memory_space<vmem>>, %arg1: memref<32x512xbf16, #tpu.memory_space<vmem>>, %arg2: memref<1x512xf32, #tpu.memory_space<vmem>>, %arg3: memref<2x256x256xbf16, #tpu.memory_space<any>>, %arg4: memref<1x512xf32, #tpu.memory_space<vmem>>, %arg5: memref<2x256x2xbf16, #tpu.memory_space<vmem>>, %arg6: memref<1x2xf32, #tpu.memory_space<vmem>>, %arg7: memref<8x2xf32, #tpu.memory_space<vmem>>, %arg8: memref<2x256x256xbf16, #tpu.memory_space<vmem>>, %arg9: memref<!tpu.dma_semaphore, #tpu.memory_space<semaphore_mem>>) attributes {dimension_semantics = [], scalar_prefetch = 0 : i64, scratch_operands = 2 : i64, tpu.core_type = #tpu.core_type<tc>} {
    tpu.enqueue_dma source(%arg3 : memref<2x256x256xbf16, #tpu.memory_space<any>>) target(%arg8 : memref<2x256x256xbf16, #tpu.memory_space<vmem>>) target_semaphore(%arg9 : memref<!tpu.dma_semaphore, #tpu.memory_space<semaphore_mem>>)
    %c0 = arith.constant 0 : index
    %c0_0 = arith.constant 0 : index
    %0 = vector.load %arg0[%c0, %c0_0] : memref<8x32xf32, #tpu.memory_space<vmem>>, vector<8x32xf32>
    %1 = arith.truncf %0 : vector<8x32xf32> to vector<8x32xbf16>
    %c0_1 = arith.constant 0 : index
    %c0_2 = arith.constant 0 : index
    %2 = vector.load %arg1[%c0_1, %c0_2] : memref<32x512xbf16, #tpu.memory_space<vmem>>, vector<32x512xbf16>
    %cst = arith.constant dense<0.000000e+00> : vector<8x512xf32>
    %3 = tpu.matmul %1, %2, %cst {dimension_numbers = #tpu.dot_dimension_numbers<[1], [0], [0], [1], [0, 0, 1, 1], [], []>} : vector<8x32xbf16>, vector<32x512xbf16>, vector<8x512xf32> -> vector<8x512xf32>
    %c0_3 = arith.constant 0 : index
    %c0_4 = arith.constant 0 : index
    %4 = vector.load %arg2[%c0_3, %c0_4] : memref<1x512xf32, #tpu.memory_space<vmem>>, vector<1x512xf32>
    %5 = vector.broadcast %4 : vector<1x512xf32> to vector<8x512xf32>
    %6 = arith.addf %3, %5 : vector<8x512xf32>
    %cst_5 = arith.constant 0.000000e+00 : f32
    %7 = vector.broadcast %cst_5 : f32 to vector<8x512xf32>
    %8 = arith.maximumf %6, %7 : vector<8x512xf32>
    %9 = vector.extract_strided_slice %8 {offsets = [0, 0], sizes = [8, 256], strides = [1, 1]} : vector<8x512xf32> to vector<8x256xf32>
    %10 = arith.truncf %9 : vector<8x256xf32> to vector<8x256xbf16>
    %11 = vector.extract_strided_slice %8 {offsets = [0, 256], sizes = [8, 256], strides = [1, 1]} : vector<8x512xf32> to vector<8x256xf32>
    %12 = arith.truncf %11 : vector<8x256xf32> to vector<8x256xbf16>
    tpu.wait_dma2 semaphore(%arg9 : memref<!tpu.dma_semaphore, #tpu.memory_space<semaphore_mem>>) src(%arg3 : memref<2x256x256xbf16, #tpu.memory_space<any>>) dst(%arg8 : memref<2x256x256xbf16, #tpu.memory_space<vmem>>)
    %c0_6 = arith.constant 0 : index
    %c0_7 = arith.constant 0 : index
    %c0_8 = arith.constant 0 : index
    %13 = vector.load %arg8[%c0_6, %c0_7, %c0_8] : memref<2x256x256xbf16, #tpu.memory_space<vmem>>, vector<1x256x256xbf16>
    %14 = vector.shape_cast %13 : vector<1x256x256xbf16> to vector<256x256xbf16>
    %cst_9 = arith.constant dense<0.000000e+00> : vector<8x256xf32>
    %15 = tpu.matmul %10, %14, %cst_9 {dimension_numbers = #tpu.dot_dimension_numbers<[1], [0], [0], [1], [0, 0, 1, 1], [], []>} : vector<8x256xbf16>, vector<256x256xbf16>, vector<8x256xf32> -> vector<8x256xf32>
    %c0_10 = arith.constant 0 : index
    %c0_11 = arith.constant 0 : index
    %16 = vector.load %arg4[%c0_10, %c0_11] : memref<1x512xf32, #tpu.memory_space<vmem>>, vector<1x256xf32>
    %17 = vector.broadcast %16 : vector<1x256xf32> to vector<8x256xf32>
    %18 = arith.addf %15, %17 : vector<8x256xf32>
    %cst_12 = arith.constant 0.000000e+00 : f32
    %19 = vector.broadcast %cst_12 : f32 to vector<8x256xf32>
    %20 = arith.maximumf %18, %19 : vector<8x256xf32>
    %c1 = arith.constant 1 : index
    %c0_13 = arith.constant 0 : index
    %c0_14 = arith.constant 0 : index
    %21 = vector.load %arg8[%c1, %c0_13, %c0_14] : memref<2x256x256xbf16, #tpu.memory_space<vmem>>, vector<1x256x256xbf16>
    %22 = vector.shape_cast %21 : vector<1x256x256xbf16> to vector<256x256xbf16>
    %cst_15 = arith.constant dense<0.000000e+00> : vector<8x256xf32>
    %23 = tpu.matmul %12, %22, %cst_15 {dimension_numbers = #tpu.dot_dimension_numbers<[1], [0], [0], [1], [0, 0, 1, 1], [], []>} : vector<8x256xbf16>, vector<256x256xbf16>, vector<8x256xf32> -> vector<8x256xf32>
    %c0_16 = arith.constant 0 : index
    %c256 = arith.constant 256 : index
    %24 = vector.load %arg4[%c0_16, %c256] : memref<1x512xf32, #tpu.memory_space<vmem>>, vector<1x256xf32>
    %25 = vector.broadcast %24 : vector<1x256xf32> to vector<8x256xf32>
    %26 = arith.addf %23, %25 : vector<8x256xf32>
    %cst_17 = arith.constant 0.000000e+00 : f32
    %27 = vector.broadcast %cst_17 : f32 to vector<8x256xf32>
    %28 = arith.maximumf %26, %27 : vector<8x256xf32>
    %29 = arith.truncf %20 : vector<8x256xf32> to vector<8x256xbf16>
    %c0_18 = arith.constant 0 : index
    %c0_19 = arith.constant 0 : index
    %c0_20 = arith.constant 0 : index
    %30 = vector.load %arg5[%c0_18, %c0_19, %c0_20] : memref<2x256x2xbf16, #tpu.memory_space<vmem>>, vector<1x256x2xbf16>
    %31 = vector.shape_cast %30 : vector<1x256x2xbf16> to vector<256x2xbf16>
    %cst_21 = arith.constant dense<0.000000e+00> : vector<8x2xf32>
    %32 = tpu.matmul %29, %31, %cst_21 {dimension_numbers = #tpu.dot_dimension_numbers<[1], [0], [0], [1], [0, 0, 1, 1], [], []>} : vector<8x256xbf16>, vector<256x2xbf16>, vector<8x2xf32> -> vector<8x2xf32>
    %33 = arith.truncf %28 : vector<8x256xf32> to vector<8x256xbf16>
    %c1_22 = arith.constant 1 : index
    %c0_23 = arith.constant 0 : index
    %c0_24 = arith.constant 0 : index
    %34 = vector.load %arg5[%c1_22, %c0_23, %c0_24] : memref<2x256x2xbf16, #tpu.memory_space<vmem>>, vector<1x256x2xbf16>
    %35 = vector.shape_cast %34 : vector<1x256x2xbf16> to vector<256x2xbf16>
    %cst_25 = arith.constant dense<0.000000e+00> : vector<8x2xf32>
    %36 = tpu.matmul %33, %35, %cst_25 {dimension_numbers = #tpu.dot_dimension_numbers<[1], [0], [0], [1], [0, 0, 1, 1], [], []>} : vector<8x256xbf16>, vector<256x2xbf16>, vector<8x2xf32> -> vector<8x2xf32>
    %37 = arith.addf %32, %36 : vector<8x2xf32>
    %c0_26 = arith.constant 0 : index
    %c0_27 = arith.constant 0 : index
    %38 = vector.load %arg6[%c0_26, %c0_27] : memref<1x2xf32, #tpu.memory_space<vmem>>, vector<1x2xf32>
    %39 = vector.broadcast %38 : vector<1x2xf32> to vector<8x2xf32>
    %40 = arith.addf %37, %39 : vector<8x2xf32>
    %c0_28 = arith.constant 0 : index
    %c0_29 = arith.constant 0 : index
    %41 = vector.load %arg7[%c0_28, %c0_29] : memref<8x2xf32, #tpu.memory_space<vmem>>, vector<8x2xf32>
    tpu.vector_store %arg7[%c0_28, %c0_29], %40 {strides = array<i32>} : memref<8x2xf32, #tpu.memory_space<vmem>>, vector<8x2xf32>,
    return
  }
}

</mosaic_0001>

<bundles_post_ra>
// kernel: critic_forward.1
= control target key start
LH: loop header
LB: loop body
LE: loop exit
PB: predicated region body
PF: predicated region fallthrough
CT: control target
= control target key end

     0   :  { %v1411_v1 = vmov 0   ;;  %vm108_vm0 = vcmask 261120   ;;  %s1412_s19 = smov [#allocation2]   ;;  %s1610_s1 = inlined_call_operand.vmem [shape: bf16[32,512], index: 1, kind: input, shape index: {}]   ;;  %s1611_s0 = inlined_call_operand.vmem [shape: f32[8,32], index: 0, kind: input, shape index: {}]   ;;  %s1612_s3 = inlined_call_operand.hbm [shape: bf16[2,256,256], index: 3, kind: input, shape index: {}]   ;;  %s1613_s4 = inlined_call_operand.vmem [shape: f32[1,512], index: 4, kind: input, shape index: {}]   ;;  %s1614_s5 = inlined_call_operand.vmem [shape: bf16[2,256,2], index: 5, kind: input, shape index: {}]   ;;  %s1615_s6 = inlined_call_operand.vmem [shape: f32[1,2], index: 6, kind: input, shape index: {}]   ;;  %s1616_s7 = inlined_call_operand.vmem [shape: f32[8,2], index: 7, kind: output, shape index: {}]   ;;  %s1617_s2 = inlined_call_operand.vmem [shape: f32[1,512], index: 2, kind: input, shape index: {}]  }
   0x1   :  { %v1249_v0 = vld [vmem:[%s1610_s1 + $0x24] ss:$16 sps:$4 sm:$0xff]   ;;  %144 = vmatprep.mubr.bf16.mxu0 %v1411_v1  ;;  %185 = vmatprep.mubr.bf16.mxu1 %v1411_v1  ;;  %v1251_v2 = vld [vmem:[%s1610_s1 + $0x2c] ss:$16 sps:$4 sm:$0xff]   ;;  %v1253_v3 = vld [vmem:[%s1610_s1 + $0x20] ss:$16 sps:$4 sm:$0xff]  }
   0x2   :  { %124 = vmatprep.subr.bf16.mxu0 %v1249_v0  ;;  %v1254_v4 = vld [vmem:[%s1610_s1 + $0x28] ss:$16 sps:$4 sm:$0xff]   ;;  %165 = vmatprep.subr.bf16.mxu1 %v1251_v2  ;;  %v1255_v5 = vld [vmem:[%s1610_s1 + $0x4] ss:$16 sps:$4 sm:$0xff]   ;;  %v1257_v6 = vld [vmem:[%s1610_s1 + $0xc] ss:$16 sps:$4 sm:$0xff]  }
   0x3   :  { %125 = vmatpush1.bf16.msra.mxu0 %v1253_v3  ;;  %166 = vmatpush1.bf16.msra.mxu1 %v1254_v4  ;;  %v1259_v7 = vld [vmem:[%s1610_s1] ss:$16 sps:$4 sm:$0xff]   ;;  %v1260_v8 = vld [vmem:[%s1610_s1 + $0x8] ss:$16 sps:$4 sm:$0xff]   ;;  %s32_s20 = sshll.u32 %s1412_s19, 4  ;;  %s33_s20 = int_to_ptr.vmem [resolvable:$true] %s32_s20 }
   0x4   :  { %126 = vmatprep.subr.bf16.mxu0 %v1255_v5  ;;  %v36_v9 = vld [vmem:[%s1611_s0] sm:$0xff]  ;;  %167 = vmatprep.subr.bf16.mxu1 %v1257_v6  ;;  %s1397_s21 = scalar_lea.vmem %s33_s20, 8192  ;;  %p1402_p1 = scmp.lt.s32.totalorder %s33_s20, %s33_s20 }
   0x5   :  { %v37_v10 = vpack.c.bf16 %v36_v9, %v36_v9  ;;  %p1398_p0 = scmp.ne.s32.totalorder %s33_s20, %s1397_s21  ;;  %p1403_p2 = scmp.lt.s32.totalorder %s1397_s21, %s1397_s21 }
   0x7   :  { %127 = vmatpush1.bf16.msra.mxu0 %v1259_v7  ;;  %168 = vmatpush1.bf16.msra.mxu1 %v1260_v8  ;;  %p1404_p3 = por %p1403_p2, %p1402_p1 }
   0x9   :  { %p1405_p4 = pnand %p1404_p3, %p1398_p0 }
   0xa   :  { %1071 = vmatmul.mubr.msk.bf16.vlgmr.msra.gmra.mxu0 %vm108_vm0, %v37_v10  ;;  %1072 = vmatmul.mubr.msk.bf16.vlgmr.msra.gmra.mxu1 %vm108_vm0, %v37_v10 }
   0xb   :  { %1408 = shalt.err (!%p1405_p4)  }
   0xc   :  { %35 = dma.hbm_to_vmem [thread:$0]  %s1612_s3, 8192, %s33_s20, [#allocation3]  ;;  %v48_v11 = vlaneseq  ;;  %v46_v15 = vld [vmem:[%s1617_s2] sm:$0xf] }
   0xe   :  { %v49_v12 = vshrl.u32 %v48_v11, 7 }
  0x10   :  { %v1483_v13 = vsub.s32 0, %v49_v12  ;;  %v58_v14 = vsub.s32 2, %v49_v12  ;;  %v1488_v16 = vsub.s32 1, %v49_v12  ;;  %v62_v17 = vsub.s32 3, %v49_v12 }
  0x12   :  { %v51_v18 = vrot.slane %v46_v15, %v1483_v13  ;;  %v59_v19 = vrot.slane %v46_v15, %v58_v14  ;;  %v55_v20 = vrot.slane %v46_v15, %v1488_v16  ;;  %v63_v21 = vrot.slane %v46_v15, %v62_v17 }
  0xca   :  { %v146_v22 = vpop.f32.mrf.mxu0  ;;  %v187_v23 = vpop.f32.mrf.mxu1 }
  0xcb   :  { %v147_v24 = vadd.f32 %v146_v22, %v51_v18  ;;  %v188_v25 = vadd.f32 %v187_v23, %v59_v19 }
  0xcc   :  { %v148_v26 = vpop.f32.mrf.mxu0  ;;  %v189_v27 = vpop.f32.mrf.mxu1 }
  0xcd   :  { %v194_v28 = vmax.f32 %v147_v24, 0.0  ;;  %v196_v29 = vmax.f32 %v188_v25, 0.0  ;;  %v149_v30 = vadd.f32 %v148_v26, %v55_v20  ;;  %v190_v31 = vadd.f32 %v189_v27, %v63_v21 }
  0xce   :  { %v150_v32 = vpop.f32.mrf.mxu0  ;;  %v191_v33 = vpop.f32.mrf.mxu1 }
  0xcf   :  { %v1492_v34 = vpack.c.bf16 %v194_v28, %v194_v28  ;;  %v1494_v35 = vpack.c.bf16 %v196_v29, %v196_v29  ;;  %v195_v36 = vmax.f32 %v149_v30, 0.0  ;;  %v197_v37 = vmax.f32 %v190_v31, 0.0 }
  0xd0   :  { %v151_v38 = vpop.f32.mrf.mxu0  ;;  %v192_v39 = vpop.f32.mrf.mxu1 }
  0xd1   :  { %v199_v40 = vpack.c.bf16 %v195_v36, %v195_v36  ;;  %v201_v41 = vpack.c.bf16 %v197_v37, %v197_v37 }
  0xd2   :  { %1409 = dma.done.wait [#allocation3], 8192 }
  0xd3   :  { %1410 = vsyncadd [#allocation3], 4294959104  ;;  %443 = vmatprep.mubr.bf16.mxu0 %v199_v40  ;;  %691 = vmatprep.mubr.bf16.mxu1 %v201_v41  ;;  %v1261_v42 = vld [vmem:[#allocation2 + $0x74] ss:$8 sps:$4 sm:$0xff]   ;;  %v1265_v44 = vld [vmem:[#allocation2 + $0x70] ss:$8 sps:$4 sm:$0xff]  }
  0xd4   :  { %v1263_v43 = vld [vmem:[#allocation2 + $0x174] ss:$8 sps:$4 sm:$0xff]   ;;  %411 = vmatprep.subr.bf16.mxu0 %v1261_v42  ;;  %v1266_v45 = vld [vmem:[#allocation2 + $0x170] ss:$8 sps:$4 sm:$0xff]   ;;  %v1267_v46 = vld [vmem:[#allocation2 + $0x64] ss:$8 sps:$4 sm:$0xff]  }
  0xd5   :  { %659 = vmatprep.subr.bf16.mxu1 %v1263_v43  ;;  %412 = vmatpush1.bf16.msra.mxu0 %v1265_v44  ;;  %v1269_v47 = vld [vmem:[#allocation2 + $0x164] ss:$8 sps:$4 sm:$0xff]   ;;  %v1271_v48 = vld [vmem:[#allocation2 + $0x60] ss:$8 sps:$4 sm:$0xff]   ;;  %v1273_v50 = vld [vmem:[#allocation2 + $0x54] ss:$8 sps:$4 sm:$0xff]  }
  0xd6   :  { %660 = vmatpush1.bf16.msra.mxu1 %v1266_v45  ;;  %413 = vmatprep.subr.bf16.mxu0 %v1267_v46  ;;  %v1272_v49 = vld [vmem:[#allocation2 + $0x160] ss:$8 sps:$4 sm:$0xff]   ;;  %v1275_v51 = vld [vmem:[#allocation2 + $0x154] ss:$8 sps:$4 sm:$0xff]   ;;  %v1277_v52 = vld [vmem:[#allocation2 + $0x50] ss:$8 sps:$4 sm:$0xff]  }
  0xd7   :  { %661 = vmatprep.subr.bf16.mxu1 %v1269_v47  ;;  %v1278_v53 = vld [vmem:[#allocation2 + $0x150] ss:$8 sps:$4 sm:$0xff]   ;;  %v1279_v54 = vld [vmem:[#allocation2 + $0x44] ss:$8 sps:$4 sm:$0xff]   ;;  %v1283_v56 = vld [vmem:[#allocation2 + $0x40] ss:$8 sps:$4 sm:$0xff]  }
  0xd8   :  { %v1281_v55 = vld [vmem:[#allocation2 + $0x144] ss:$8 sps:$4 sm:$0xff]   ;;  %v1284_v57 = vld [vmem:[#allocation2 + $0x140] ss:$8 sps:$4 sm:$0xff]   ;;  %v1285_v58 = vld [vmem:[#allocation2 + $0x34] ss:$8 sps:$4 sm:$0xff]  }
  0xd9   :  { %414 = vmatpush1.bf16.msra.mxu0 %v1271_v48  ;;  %v1287_v59 = vld [vmem:[#allocation2 + $0x134] ss:$8 sps:$4 sm:$0xff]   ;;  %v1289_v60 = vld [vmem:[#allocation2 + $0x30] ss:$8 sps:$4 sm:$0xff]   ;;  %v1291_v62 = vld [vmem:[#allocation2 + $0x24] ss:$8 sps:$4 sm:$0xff]  }
  0xda   :  { %662 = vmatpush1.bf16.msra.mxu1 %v1272_v49  ;;  %415 = vmatprep.subr.bf16.mxu0 %v1273_v50  ;;  %v1290_v61 = vld [vmem:[#allocation2 + $0x130] ss:$8 sps:$4 sm:$0xff]   ;;  %v1293_v63 = vld [vmem:[#allocation2 + $0x124] ss:$8 sps:$4 sm:$0xff]   ;;  %v1295_v0 = vld [vmem:[#allocation2 + $0x20] ss:$8 sps:$4 sm:$0xff]  }
  0xdb   :  { %663 = vmatprep.subr.bf16.mxu1 %v1275_v51  ;;  %v1296_v1 = vld [vmem:[#allocation2 + $0x120] ss:$8 sps:$4 sm:$0xff]   ;;  %v1297_v2 = vld [vmem:[#allocation2 + $0x14] ss:$8 sps:$4 sm:$0xff]   ;;  %v1301_v4 = vld [vmem:[#allocation2 + $0x10] ss:$8 sps:$4 sm:$0xff]  }
  0xdc   :  { %v1299_v3 = vld [vmem:[#allocation2 + $0x114] ss:$8 sps:$4 sm:$0xff]   ;;  %v1302_v5 = vld [vmem:[#allocation2 + $0x110] ss:$8 sps:$4 sm:$0xff]   ;;  %v1303_v6 = vld [vmem:[#allocation2 + $0x4] ss:$8 sps:$4 sm:$0xff]  }
  0xdd   :  { %416 = vmatpush1.bf16.msra.mxu0 %v1277_v52  ;;  %v1305_v7 = vld [vmem:[#allocation2 + $0x104] ss:$8 sps:$4 sm:$0xff]   ;;  %v1307_v8 = vld [vmem:[#allocation2] ss:$8 sps:$4 sm:$0xff]   ;;  %v1309_v10 = vld [vmem:[#allocation2 + $0xf4] ss:$8 sps:$4 sm:$0xff]  }
  0xde   :  { %664 = vmatpush1.bf16.msra.mxu1 %v1278_v53  ;;  %417 = vmatprep.subr.bf16.mxu0 %v1279_v54  ;;  %v1308_v9 = vld [vmem:[#allocation2 + $0x100] ss:$8 sps:$4 sm:$0xff]   ;;  %v1311_v11 = vld [vmem:[#allocation2 + $0x1f4] ss:$8 sps:$4 sm:$0xff]   ;;  %v1313_v12 = vld [vmem:[#allocation2 + $0xf0] ss:$8 sps:$4 sm:$0xff]  }
  0xdf   :  { %665 = vmatprep.subr.bf16.mxu1 %v1281_v55  ;;  %v1314_v14 = vld [vmem:[#allocation2 + $0x1f0] ss:$8 sps:$4 sm:$0xff]   ;;  %v1315_v15 = vld [vmem:[#allocation2 + $0xe4] ss:$8 sps:$4 sm:$0xff]   ;;  %v1319_v18 = vld [vmem:[#allocation2 + $0xe0] ss:$8 sps:$4 sm:$0xff]  }
  0xe0   :  { %v1317_v17 = vld [vmem:[#allocation2 + $0x1e4] ss:$8 sps:$4 sm:$0xff]   ;;  %v1320_v19 = vld [vmem:[#allocation2 + $0x1e0] ss:$8 sps:$4 sm:$0xff]   ;;  %v1321_v20 = vld [vmem:[#allocation2 + $0xd4] ss:$8 sps:$4 sm:$0xff]  }
  0xe1   :  { %418 = vmatpush1.bf16.msra.mxu0 %v1283_v56  ;;  %v1323_v21 = vld [vmem:[#allocation2 + $0x1d4] ss:$8 sps:$4 sm:$0xff]   ;;  %v1325_v22 = vld [vmem:[#allocation2 + $0xd0] ss:$8 sps:$4 sm:$0xff]   ;;  %v1327_v24 = vld [vmem:[#allocation2 + $0xc4] ss:$8 sps:$4 sm:$0xff]  }
  0xe2   :  { %666 = vmatpush1.bf16.msra.mxu1 %v1284_v57  ;;  %419 = vmatprep.subr.bf16.mxu0 %v1285_v58  ;;  %v1326_v23 = vld [vmem:[#allocation2 + $0x1d0] ss:$8 sps:$4 sm:$0xff]   ;;  %v1329_v25 = vld [vmem:[#allocation2 + $0x1c4] ss:$8 sps:$4 sm:$0xff]   ;;  %v1331_v26 = vld [vmem:[#allocation2 + $0xc0] ss:$8 sps:$4 sm:$0xff]  }
  0xe3   :  { %667 = vmatprep.subr.bf16.mxu1 %v1287_v59  ;;  %v1332_v27 = vld [vmem:[#allocation2 + $0x1c0] ss:$8 sps:$4 sm:$0xff]   ;;  %v1333_v28 = vld [vmem:[#allocation2 + $0xb4] ss:$8 sps:$4 sm:$0xff]   ;;  %v1337_v30 = vld [vmem:[#allocation2 + $0xb0] ss:$8 sps:$4 sm:$0xff]  }
  0xe4   :  { %v1335_v29 = vld [vmem:[#allocation2 + $0x1b4] ss:$8 sps:$4 sm:$0xff]   ;;  %v1338_v31 = vld [vmem:[#allocation2 + $0x1b0] ss:$8 sps:$4 sm:$0xff]   ;;  %v1339_v32 = vld [vmem:[#allocation2 + $0xa4] ss:$8 sps:$4 sm:$0xff]  }
  0xe5   :  { %420 = vmatpush1.bf16.msra.mxu0 %v1289_v60  ;;  %v1341_v33 = vld [vmem:[#allocation2 + $0x1a4] ss:$8 sps:$4 sm:$0xff]   ;;  %v1343_v36 = vld [vmem:[#allocation2 + $0xa0] ss:$8 sps:$4 sm:$0xff]   ;;  %v1345_v38 = vld [vmem:[#allocation2 + $0x94] ss:$8 sps:$4 sm:$0xff]  }
  0xe6   :  { %668 = vmatpush1.bf16.msra.mxu1 %v1290_v61  ;;  %421 = vmatprep.subr.bf16.mxu0 %v1291_v62  ;;  %v1344_v37 = vld [vmem:[#allocation2 + $0x1a0] ss:$8 sps:$4 sm:$0xff]   ;;  %v1347_v39 = vld [vmem:[#allocation2 + $0x194] ss:$8 sps:$4 sm:$0xff]   ;;  %v1349_v40 = vld [vmem:[#allocation2 + $0x90] ss:$8 sps:$4 sm:$0xff]  }
  0xe7   :  { %669 = vmatprep.subr.bf16.mxu1 %v1293_v63  ;;  %v1350_v41 = vld [vmem:[#allocation2 + $0x190] ss:$8 sps:$4 sm:$0xff]   ;;  %v1351_v42 = vld [vmem:[#allocation2 + $0x84] ss:$8 sps:$4 sm:$0xff]   ;;  %v1355_v44 = vld [vmem:[#allocation2 + $0x80] ss:$8 sps:$4 sm:$0xff]  }
  0xe8   :  { %v1353_v43 = vld [vmem:[#allocation2 + $0x184] ss:$8 sps:$4 sm:$0xff]   ;;  %v1356_v45 = vld [vmem:[#allocation2 + $0x180] ss:$8 sps:$4 sm:$0xff]   ;;  %v1357_v46 = vld [vmem:[%s1614_s5 + $0xf8] sm:$0xff]   ;;  %vm1051_vm1 = vcmask 15360  }
  0xe9   :  { %422 = vmatpush1.bf16.msra.mxu0 %v1295_v0  ;;  %v1358_v47 = vld [vmem:[%s1614_s5 + $0x78] sm:$0xff]   ;;  %v1361_v50 = vld [vmem:[%s1614_s5 + $0xf0] sm:$0xff]   ;;  %v1365_v54 = vld [vmem:[%s1614_s5 + $0xe8] sm:$0xff]  }
  0xea   :  { %670 = vmatpush1.bf16.msra.mxu1 %v1296_v1  ;;  %423 = vmatprep.subr.bf16.mxu0 %v1297_v2  ;;  %v1359_v48 = vld [vmem:[%s1614_s5 + $0xb8] sm:$0xff]   ;;  %v1362_v51 = vld [vmem:[%s1614_s5 + $0x70] sm:$0xff]   ;;  %v1366_v55 = vld [vmem:[%s1614_s5 + $0x68] sm:$0xff]  }
  0xeb   :  { %671 = vmatprep.subr.bf16.mxu1 %v1299_v3  ;;  %v1360_v49 = vld [vmem:[%s1614_s5 + $0x38] sm:$0xff]   ;;  %v1363_v52 = vld [vmem:[%s1614_s5 + $0xb0] sm:$0xff]   ;;  %v1369_v56 = vld [vmem:[%s1614_s5 + $0xe0] sm:$0xff]  }
  0xec   :  { %v1364_v53 = vld [vmem:[%s1614_s5 + $0x30] sm:$0xff]   ;;  %v1370_v57 = vld [vmem:[%s1614_s5 + $0x60] sm:$0xff]   ;;  %v1373_v60 = vld [vmem:[%s1614_s5 + $0xd8] sm:$0xff]  }
  0xed   :  { %424 = vmatpush1.bf16.msra.mxu0 %v1301_v4  ;;  %v1371_v58 = vld [vmem:[%s1614_s5 + $0xa0] sm:$0xff]   ;;  %v1374_v61 = vld [vmem:[%s1614_s5 + $0x58] sm:$0xff]   ;;  %v1377_v0 = vld [vmem:[%s1614_s5 + $0xd0] sm:$0xff]  }
  0xee   :  { %672 = vmatpush1.bf16.msra.mxu1 %v1302_v5  ;;  %425 = vmatprep.subr.bf16.mxu0 %v1303_v6  ;;  %v1372_v59 = vld [vmem:[%s1614_s5 + $0x20] sm:$0xff]   ;;  %v1375_v62 = vld [vmem:[%s1614_s5 + $0x98] sm:$0xff]   ;;  %v1378_v1 = vld [vmem:[%s1614_s5 + $0x50] sm:$0xff]  }
  0xef   :  { %673 = vmatprep.subr.bf16.mxu1 %v1305_v7  ;;  %v1376_v63 = vld [vmem:[%s1614_s5 + $0x18] sm:$0xff]   ;;  %v1379_v2 = vld [vmem:[%s1614_s5 + $0x90] sm:$0xff]   ;;  %v1381_v4 = vld [vmem:[%s1614_s5 + $0xc8] sm:$0xff]  }
  0xf0   :  { %v1380_v3 = vld [vmem:[%s1614_s5 + $0x10] sm:$0xff]   ;;  %v1382_v5 = vld [vmem:[%s1614_s5 + $0x48] sm:$0xff]  }
  0xf1   :  { %426 = vmatpush1.bf16.msra.mxu0 %v1307_v8  ;;  %v1383_v6 = vld [vmem:[%s1614_s5 + $0x88] sm:$0xff]   ;;  %v1385_v8 = vld [vmem:[%s1614_s5 + $0xc0] sm:$0xff]  }
  0xf2   :  { %674 = vmatpush1.bf16.msra.mxu1 %v1308_v9  ;;  %427 = vmatprep.subr.bf16.mxu0 %v1309_v10  ;;  %v1384_v7 = vld [vmem:[%s1614_s5 + $0x8] sm:$0xff]   ;;  %v1386_v9 = vld [vmem:[%s1614_s5 + $0x40] sm:$0xff]  }
  0xf3   :  { %675 = vmatprep.subr.bf16.mxu1 %v1311_v11  ;;  %v1387_v10 = vld [vmem:[%s1614_s5 + $0x80] sm:$0xff]  }
  0xf4   :  { %v1388_v11 = vld [vmem:[%s1614_s5] sm:$0xff]  }
  0xf5   :  { %428 = vmatpush2.bf16.msra.mxu0 %v1313_v12  ;;  %v239_v12 = vld [vmem:[%s1613_s4] sm:$0x3] }
  0xf6   :  { %676 = vmatpush2.bf16.msra.mxu1 %v1314_v14  ;;  %429 = vmatprep.subr.bf16.mxu0 %v1315_v15  ;;  %v487_v14 = vld [vmem:[%s1613_s4 + $0x2] sm:$0x3]  ;;  %v244_v15 = vrot.slane %v239_v12, %v1483_v13 }
  0xf7   :  { %677 = vmatprep.subr.bf16.mxu1 %v1317_v17  ;;  %v492_v17 = vrot.slane %v487_v14, %v1483_v13 }
  0xf9   :  { %430 = vmatpush2.bf16.msra.mxu0 %v1319_v18  ;;  %v248_v18 = vrot.slane %v239_v12, %v1488_v16 }
  0xfa   :  { %678 = vmatpush2.bf16.msra.mxu1 %v1320_v19  ;;  %431 = vmatprep.subr.bf16.mxu0 %v1321_v20  ;;  %v496_v19 = vrot.slane %v487_v14, %v1488_v16 }
  0xfb   :  { %679 = vmatprep.subr.bf16.mxu1 %v1323_v21 }
  0xfd   :  { %432 = vmatpush2.bf16.msra.mxu0 %v1325_v22 }
  0xfe   :  { %680 = vmatpush2.bf16.msra.mxu1 %v1326_v23  ;;  %433 = vmatprep.subr.bf16.mxu0 %v1327_v24 }
  0xff   :  { %681 = vmatprep.subr.bf16.mxu1 %v1329_v25 }
 0x101   :  { %434 = vmatpush2.bf16.msra.mxu0 %v1331_v26 }
 0x102   :  { %682 = vmatpush2.bf16.msra.mxu1 %v1332_v27  ;;  %435 = vmatprep.subr.bf16.mxu0 %v1333_v28 }
 0x103   :  { %683 = vmatprep.subr.bf16.mxu1 %v1335_v29 }
 0x105   :  { %436 = vmatpush2.bf16.msra.mxu0 %v1337_v30 }
 0x106   :  { %684 = vmatpush2.bf16.msra.mxu1 %v1338_v31  ;;  %437 = vmatprep.subr.bf16.mxu0 %v1339_v32 }
 0x107   :  { %685 = vmatprep.subr.bf16.mxu1 %v1341_v33 }
 0x109   :  { %438 = vmatpush2.bf16.msra.mxu0 %v1343_v36 }
 0x10a   :  { %686 = vmatpush2.bf16.msra.mxu1 %v1344_v37  ;;  %439 = vmatprep.subr.bf16.mxu0 %v1345_v38 }
 0x10b   :  { %687 = vmatprep.subr.bf16.mxu1 %v1347_v39 }
 0x10d   :  { %440 = vmatpush2.bf16.msra.mxu0 %v1349_v40 }
 0x10e   :  { %688 = vmatpush2.bf16.msra.mxu1 %v1350_v41  ;;  %441 = vmatprep.subr.bf16.mxu0 %v1351_v42 }
 0x10f   :  { %689 = vmatprep.subr.bf16.mxu1 %v1353_v43 }
 0x111   :  { %442 = vmatpush2.bf16.msra.mxu0 %v1355_v44 }
 0x112   :  { %690 = vmatpush2.bf16.msra.mxu1 %v1356_v45  ;;  %1203 = vmatprep.subr.bf16.mxu0 %v1357_v46  ;;  %v1201_v46 = vld [vmem:[%s1615_s6] ss:$0 sm:$0xff] }
 0x113   :  { %1225 = vmatprep.subr.bf16.mxu1 %v1358_v47 }
 0x114   :  { %444 = vmatmul.mubr.bf16.vlgmr.msra.gmra.mxu0 %v1492_v34  ;;  %v1367_v34 = vld [vmem:[%s1614_s5 + $0xa8] sm:$0xff]  }
 0x115   :  { %692 = vmatmul.mubr.bf16.vlgmr.msra.gmra.mxu1 %v1494_v35  ;;  %1204 = vmatpush3.bf16.msra.mxu0 %v1359_v48  ;;  %v1368_v35 = vld [vmem:[%s1614_s5 + $0x28] sm:$0xff]  }
 0x116   :  { %1226 = vmatpush3.bf16.msra.mxu1 %v1360_v49  ;;  %1205 = vmatprep.subr.bf16.mxu0 %v1361_v50 }
 0x117   :  { %1227 = vmatprep.subr.bf16.mxu1 %v1362_v51 }
 0x119   :  { %1206 = vmatpush3.bf16.msra.mxu0 %v1363_v52 }
 0x11a   :  { %1228 = vmatpush3.bf16.msra.mxu1 %v1364_v53  ;;  %1207 = vmatprep.subr.bf16.mxu0 %v1365_v54 }
 0x11b   :  { %1229 = vmatprep.subr.bf16.mxu1 %v1366_v55 }
 0x11d   :  { %1208 = vmatpush3.bf16.msra.mxu0 %v1367_v34 }
 0x11e   :  { %1230 = vmatpush3.bf16.msra.mxu1 %v1368_v35  ;;  %1209 = vmatprep.subr.bf16.mxu0 %v1369_v56 }
 0x11f   :  { %1231 = vmatprep.subr.bf16.mxu1 %v1370_v57 }
 0x121   :  { %1210 = vmatpush3.bf16.msra.mxu0 %v1371_v58 }
 0x122   :  { %1232 = vmatpush3.bf16.msra.mxu1 %v1372_v59  ;;  %1211 = vmatprep.subr.bf16.mxu0 %v1373_v60 }
 0x123   :  { %1233 = vmatprep.subr.bf16.mxu1 %v1374_v61 }
 0x125   :  { %1212 = vmatpush3.bf16.msra.mxu0 %v1375_v62 }
 0x126   :  { %1234 = vmatpush3.bf16.msra.mxu1 %v1376_v63  ;;  %1213 = vmatprep.subr.bf16.mxu0 %v1377_v0 }
 0x127   :  { %1235 = vmatprep.subr.bf16.mxu1 %v1378_v1 }
 0x129   :  { %1214 = vmatpush3.bf16.msra.mxu0 %v1379_v2 }
 0x12a   :  { %1236 = vmatpush3.bf16.msra.mxu1 %v1380_v3  ;;  %1215 = vmatprep.subr.bf16.mxu0 %v1381_v4 }
 0x12b   :  { %1237 = vmatprep.subr.bf16.mxu1 %v1382_v5 }
 0x12d   :  { %1216 = vmatpush3.bf16.msra.mxu0 %v1383_v6 }
 0x12e   :  { %1238 = vmatpush3.bf16.msra.mxu1 %v1384_v7  ;;  %1217 = vmatprep.subr.bf16.mxu0 %v1385_v8 }
 0x12f   :  { %1239 = vmatprep.subr.bf16.mxu1 %v1386_v9 }
 0x131   :  { %1218 = vmatpush3.bf16.msra.mxu0 %v1387_v10 }
 0x132   :  { %1240 = vmatpush3.bf16.msra.mxu1 %v1388_v11 }
 0x1d4   :  { %v445_v20 = vpop.f32.mrf.mxu0 }
 0x1d5   :  { %v693_v21 = vpop.f32.mrf.mxu1  ;;  %v446_v22 = vadd.f32 %v445_v20, %v244_v15 }
 0x1d6   :  { %v694_v23 = vadd.f32 %v693_v21, %v492_v17  ;;  %v447_v24 = vpop.f32.mrf.mxu0 }
 0x1d7   :  { %v695_v25 = vpop.f32.mrf.mxu1  ;;  %v448_v26 = vadd.f32 %v447_v24, %v248_v18  ;;  %v452_v28 = vmax.f32 %v446_v22, 0.0 }
 0x1d8   :  { %v696_v27 = vadd.f32 %v695_v25, %v496_v19  ;;  %v700_v29 = vmax.f32 %v694_v23, 0.0  ;;  %v449_v30 = vpop.f32.mrf.mxu0 }
 0x1d9   :  { %v697_v31 = vpop.f32.mrf.mxu1  ;;  %v453_v32 = vmax.f32 %v448_v26, 0.0  ;;  %v702_v39 = vpack.c.bf16 %v452_v28, %v452_v28 }
 0x1da   :  { %v701_v33 = vmax.f32 %v696_v27, 0.0  ;;  %v450_v36 = vpop.f32.mrf.mxu0  ;;  %v736_v16 = vpack.c.bf16 %v700_v29, %v700_v29 }
 0x1db   :  { %v698_v13 = vpop.f32.mrf.mxu1  ;;  %v703_v37 = vpack.c.bf16 %v453_v32, %v453_v32 }
 0x1dc   :  { %v737_v38 = vpack.c.bf16 %v701_v33, %v701_v33 }
 0x1dd   :  { %1035 = vmatprep.mubr.bf16.mxu1 %v703_v37 }
 0x1de   :  { %899 = vmatprep.mubr.bf16.mxu0 %v737_v38  ;;  %1036 = vmatmul.mubr.bf16.vlgmr.msra.gmra.mxu1 %v702_v39 }
 0x1df   :  { %900 = vmatmul.mubr.bf16.vlgmr.msra.gmra.mxu0 %v736_v16 }
 0x29e   :  { %v1241_v41 = vpop.f32.mrf.mxu1 }
 0x29f   :  { %v1219_v40 = vpop.f32.mrf.mxu0 }
 0x2a0   :  { %v1242_v43 = vpop.f32.mrf.mxu1 }
 0x2a1   :  { %v1220_v42 = vpop.f32.mrf.mxu0  ;;  %v1243_v45 = vadd.f32 %v1242_v43, %v1241_v41 }
 0x2a2   :  { %v1221_v44 = vadd.f32 %v1220_v42, %v1219_v40  ;;  %v1244_v48 = vpop.f32.mrf.mxu1 }
 0x2a3   :  { %v1222_v47 = vpop.f32.mrf.mxu0 }
 0x2a4   :  { %v1038_v49 = vadd.f32 %v1243_v45, %v1221_v44  ;;  %v1245_v51 = vpop.f32.mrf.mxu1 }
 0x2a5   :  { %v1223_v50 = vpop.f32.mrf.mxu0 }
 0x2a6   :  { %v1050_v52 = vadd.f32 %v1201_v46, %v1038_v49 }
 0x2a8   :  { %1052 = vst.msk [vmem:[%s1616_s7] sm:$0xff] %vm1051_vm1, %v1050_v52 }
 0x2a9   :  { %1057 = vsyncmov [#allocation3] }
 0x2ac   :  { %s1058_s15 = vpop.sfrf %1057 }
 0x2ad   :  { %p1202_p5 = scmp.ne.s32.totalorder %s1058_s15, 0 }
 0x2af   :  { %1062 = shalt.err (%p1202_p5)  }

</bundles_post_ra>
